<compile_context>
chip_gen: v7x
topology: tpu7x:2x2x1
jax: 0.10.0
libtpu: 0.0.40
codegen_flags: <defaults>
</compile_context>

<pallas_src>
import functools
import math

import jax
import jax.numpy as jnp
import numpy as np
from jax.experimental import pallas as pl
from jax.experimental.pallas import tpu as pltpu


# ---------------------------------------------------------------------------
# Helpers
# ---------------------------------------------------------------------------
def _round_up(x, m):
    return ((x + m - 1) // m) * m


def _pick_tile(total, target, unit):
    """Largest multiple of `unit` <= max(target, unit) that divides `total`.
    `total` must itself be a multiple of `unit`."""
    t = min(total, max(unit, (target // unit) * unit))
    while total % t:
        t -= unit
    return t


def _hw_config():
    """Generation-aware (vmem_limit_bytes, multi_core) heuristic.

    v5e/v6e: 128 MiB VMEM, single TensorCore  -> 96 MiB limit, no forced split.
    v7x (or unknown): 64 MiB per TC, 2 TCs    -> 40 MiB limit, keep >=2 parallel steps.
    """
    vmem_phys = None
    try:
        info = pltpu.get_tpu_info()
        v = int(getattr(info, "vmem_capacity_bytes", 0))
        vmem_phys = v if v > 0 else None
    except Exception:
        pass
    if vmem_phys is None:
        vmem_phys = 64 * 1024 * 1024  # conservative default
    if vmem_phys > 96 * 1024 * 1024:
        return 96 * 1024 * 1024, False
    return 40 * 1024 * 1024, True


# ---------------------------------------------------------------------------
# Kernel 1: fused row-wise projection   out = [relu](x @ W^T [+ b]) [* diag]
# One (B*W, D) x (D, Hp) GEMM for all batch rows; output emitted as bf16.
# ---------------------------------------------------------------------------
def _proj_kernel(*refs, use_bias, use_relu, use_diag):
    x_ref, wt_ref = refs[0], refs[1]
    i = 2
    acc = jnp.dot(x_ref[...], wt_ref[...], preferred_element_type=jnp.float32)
    if use_bias:
        acc = acc + refs[i][...]
        i += 1
    if use_relu:
        acc = jnp.maximum(acc, 0.0)
    if use_diag:
        acc = acc * refs[i][...]
        i += 1
    out_ref = refs[i]
    out_ref[...] = acc.astype(out_ref.dtype)


def _project_rows(x2d, w_t, bias, diag, *, use_bias, use_relu, use_diag,
                  vmem_limit):
    """x2d: (M, D) f32, w_t: (D, Hp) f32 -> (M, Hp) bf16."""
    M, D = x2d.shape
    Hp = w_t.shape[1]

    # Row tile: subtract the resident (single-buffered) weight/bias/diag bytes
    # from the budget, then fill with double-buffered f32-in / bf16-out rows.
    weight_bytes = D * Hp * 4 + 2 * Hp * 4
    per_row = 2 * (D * 4) + 2 * (Hp * 2)
    budget = max(int(vmem_limit * 0.5) - weight_bytes, 8 * per_row)
    row_tile = budget // per_row
    if row_tile >= M:
        row_tile = M
    else:
        row_tile = max(8, (row_tile // 8) * 8)
        if row_tile >= 512:
            row_tile = (row_tile // 256) * 256
    grid = (pl.cdiv(M, row_tile),)

    args = [x2d, w_t]
    if use_bias:
        args.append(bias.reshape(1, Hp).astype(jnp.float32))
    if use_diag:
        args.append(diag.reshape(1, Hp).astype(jnp.float32))

    kernel = functools.partial(_proj_kernel, use_bias=use_bias,
                               use_relu=use_relu, use_diag=use_diag)

    def build_specs(single_buffer_shared):
        def shared(shape):
            if single_buffer_shared:
                # Constant index_map -> never re-fetched; single-buffer it.
                return pl.BlockSpec(shape, lambda i: (0, 0),
                                    pipeline_mode=pl.Buffered(1))
            return pl.BlockSpec(shape, lambda i: (0, 0))
        specs = [pl.BlockSpec((row_tile, D), lambda i: (i, 0)),
                 shared((D, Hp))]
        if use_bias:
            specs.append(shared((1, Hp)))
        if use_diag:
            specs.append(shared((1, Hp)))
        return specs

    last_err = None
    for single_buffer_shared in (True, False):
        try:
            return pl.pallas_call(
                kernel,
                out_shape=jax.ShapeDtypeStruct((M, Hp), jnp.bfloat16),
                grid=grid,
                in_specs=build_specs(single_buffer_shared),
                out_specs=pl.BlockSpec((row_tile, Hp), lambda i: (i, 0)),
                compiler_params=pltpu.CompilerParams(
                    dimension_semantics=("parallel",),
                    vmem_limit_bytes=vmem_limit),
            )(*args)
        except Exception as e:  # pragma: no cover - fallback to default buffering
            last_err = e
    raise last_err


# ---------------------------------------------------------------------------
# Kernel 2: tiled batched score matmul  scores[b] = x1_rep[b] @ x2_rep[b]^T
# bf16 operands, f32 VMEM accumulator over the K (feature) grid axis.
# ---------------------------------------------------------------------------
def _scores_kernel(x1_ref, x2_ref, out_ref, acc_ref):
    @pl.when(pl.program_id(3) == 0)
    def _():
        acc_ref[...] = jnp.zeros_like(acc_ref)

    acc_ref[...] += jax.lax.dot_general(
        x1_ref[...], x2_ref[...],
        dimension_numbers=(((2,), (2,)), ((0,), (0,))),
        preferred_element_type=jnp.float32)

    @pl.when(pl.program_id(3) == pl.num_programs(3) - 1)
    def _():
        out_ref[...] = acc_ref[...].astype(out_ref.dtype)


def _batched_scores(x1_rep, x2_rep, *, vmem_limit, multi_core):
    """x1_rep: (B, W1p, Hp) bf16, x2_rep: (B, W2p, Hp) bf16 -> (B, W1p, W2p) f32.
    Requires W1p % 8 == 0, W2p % 128 == 0, Hp % 128 == 0 (the wrapper pads)."""
    B, W1p, Hp = x1_rep.shape
    _, W2p, _ = x2_rep.shape

    budget = int(vmem_limit * 0.75)
    tw1_t, tw2_t, tk_t = 256, 512, 512
    while True:
        tw1 = _pick_tile(W1p, tw1_t, 8)
        tw2 = _pick_tile(W2p, tw2_t, 128)
        tk = _pick_tile(Hp, tk_t, 128)
        # dbl-buffered bf16 x1/x2 blocks + dbl-buffered f32 out + f32 acc scratch
        per_b = 4 * tk * (tw1 + tw2) + 12 * tw1 * tw2
        if per_b <= budget or (tw1 <= 8 and tw2 <= 128 and tk <= 128):
            break
        if tw2_t > 128:
            tw2_t //= 2
        elif tk_t > 128:
            tk_t //= 2
        else:
            tw1_t = max(8, tw1_t // 2)

    tb = max(1, min(B, budget // per_b))
    n_parallel = pl.cdiv(B, tb) * (W1p // tw1) * (W2p // tw2)
    if multi_core and B > 1 and n_parallel < 2:
        tb = (B + 1) // 2  # keep >=2 parallel grid steps for v7x megacore

    grid = (pl.cdiv(B, tb), W1p // tw1, W2p // tw2, Hp // tk)

    return pl.pallas_call(
        _scores_kernel,
        out_shape=jax.ShapeDtypeStruct((B, W1p, W2p), jnp.float32),
        grid=grid,
        in_specs=[
            pl.BlockSpec((tb, tw1, tk), lambda b, i, j, k: (b, i, k)),
            pl.BlockSpec((tb, tw2, tk), lambda b, i, j, k: (b, j, k)),
        ],
        out_specs=pl.BlockSpec((tb, tw1, tw2), lambda b, i, j, k: (b, i, j)),
        scratch_shapes=[pltpu.VMEM((tb, tw1, tw2), jnp.float32)],
        compiler_params=pltpu.CompilerParams(
            dimension_semantics=("parallel", "parallel", "parallel", "arbitrary"),
            vmem_limit_bytes=vmem_limit),
    )(x1_rep, x2_rep)


# ---------------------------------------------------------------------------
# Wrapper: AttentionScore.forward (eval mode)
# ---------------------------------------------------------------------------
def attention_score(x1, x2, params, correlation_func=1):
    """x1: (B, W1, D), x2: (B, W2, D) -> scores (B, W1, W2).

    params (PyTorch layouts):
      'w'    : (H_out, D) nn.Linear weight        (funcs 2-5)
      'b'    : (H_out,)   nn.Linear bias          (funcs 2, 3)
      'diag' : diagonal parameter                 (funcs 2, 3)
    """
    # TODO(synk): dropout is training-mode only (identity in eval), so omitted.
    vmem_limit, multi_core = _hw_config()
    x1 = jnp.asarray(x1, jnp.float32)
    x2 = jnp.asarray(x2, jnp.float32)
    B, W1, D = x1.shape
    _, W2, _ = x2.shape

    if correlation_func in (2, 3, 4, 5):
        w = jnp.asarray(params['w'], jnp.float32)      # (H_out, D)
        H = w.shape[0]
        Hp = _round_up(H, 128)                         # lane-dense projection width
        w_t = jnp.pad(jnp.transpose(w), ((0, 0), (0, Hp - H)))   # (D, Hp)

    if correlation_func in (2, 3):
        bias = jnp.pad(jnp.asarray(params['b'], jnp.float32), (0, Hp - H))
        diag = jnp.pad(jnp.asarray(params['diag'], jnp.float32).reshape(-1),
                       (0, Hp - H))
        relu = correlation_func == 3
        x1_rep = _project_rows(x1.reshape(B * W1, D), w_t, bias, diag,
                               use_bias=True, use_relu=relu, use_diag=True,
                               vmem_limit=vmem_limit).reshape(B, W1, Hp)
        x2_rep = _project_rows(x2.reshape(B * W2, D), w_t, bias, None,
                               use_bias=True, use_relu=relu, use_diag=False,
                               vmem_limit=vmem_limit).reshape(B, W2, Hp)
    elif correlation_func == 4:
        # W is (D, D), bias-free; only x2 is projected. Pad x1's features too.
        x1_rep = jnp.pad(x1, ((0, 0), (0, 0), (0, Hp - D))).astype(jnp.bfloat16)
        x2_rep = _project_rows(x2.reshape(B * W2, D), w_t, None, None,
                               use_bias=False, use_relu=False, use_diag=False,
                               vmem_limit=vmem_limit).reshape(B, W2, Hp)
    elif correlation_func == 5:
        x1_rep = _project_rows(x1.reshape(B * W1, D), w_t, None, None,
                               use_bias=False, use_relu=True, use_diag=False,
                               vmem_limit=vmem_limit).reshape(B, W1, Hp)
        x2_rep = _project_rows(x2.reshape(B * W2, D), w_t, None, None,
                               use_bias=False, use_relu=True, use_diag=False,
                               vmem_limit=vmem_limit).reshape(B, W2, Hp)
    else:  # correlation_func == 1: raw features, zero-pad the contraction dim
        Hp = _round_up(D, 128)
        x1_rep = jnp.pad(x1, ((0, 0), (0, 0), (0, Hp - D))).astype(jnp.bfloat16)
        x2_rep = jnp.pad(x2, ((0, 0), (0, 0), (0, Hp - D))).astype(jnp.bfloat16)

    # Pad word dims so the score kernel is sublane/lane dense everywhere
    # (zero rows only add zero-valued score rows/cols, sliced off below).
    W1p = _round_up(W1, 8)
    W2p = _round_up(W2, 128)
    if W1p != W1:
        x1_rep = jnp.pad(x1_rep, ((0, 0), (0, W1p - W1), (0, 0)))
    if W2p != W2:
        x2_rep = jnp.pad(x2_rep, ((0, 0), (0, W2p - W2), (0, 0)))

    scores = _batched_scores(x1_rep, x2_rep, vmem_limit=vmem_limit,
                             multi_core=multi_core)
    return scores[:, :W1, :W2]


# ---------------------------------------------------------------------------
# Pure-JAX reference (mirrors the PyTorch module, eval mode; reps rounded to
# bf16 to match the kernel's MXU operand dtype, accumulation in f32).
# ---------------------------------------------------------------------------
def _reference(x1, x2, params, correlation_func=1):
    x1_rep, x2_rep = x1, x2
    if correlation_func in (2, 3):
        w, b = params['w'], params['b']
        x1_rep = x1 @ w.T + b
        x2_rep = x2 @ w.T + b
        if correlation_func == 3:
            x1_rep = jnp.maximum(x1_rep, 0.0)
            x2_rep = jnp.maximum(x2_rep, 0.0)
        x1_rep = x1_rep * params['diag'].reshape(1, 1, -1)
    elif correlation_func == 4:
        x2_rep = x2 @ params['w'].T
    elif correlation_func == 5:
        x1_rep = jnp.maximum(x1 @ params['w'].T, 0.0)
        x2_rep = jnp.maximum(x2 @ params['w'].T, 0.0)
    x1_rep = x1_rep.astype(jnp.bfloat16).astype(jnp.float32)
    x2_rep = x2_rep.astype(jnp.bfloat16).astype(jnp.float32)
    return jnp.einsum('bwd,bvd->bwv', x1_rep, x2_rep)


if __name__ == "__main__":
    B, W1, W2, D, H = 2, 8, 16, 32, 16

    key = jax.random.PRNGKey(0)
    k1, k2, kw, kb, kw4 = jax.random.split(key, 5)

    x1 = jax.random.normal(k1, (B, W1, D), dtype=jnp.float32)
    x2 = jax.random.normal(k2, (B, W2, D), dtype=jnp.float32)

    bound = 1.0 / math.sqrt(D)
    w = jax.random.uniform(kw, (H, D), minval=-bound, maxval=bound, dtype=jnp.float32)
    b = jax.random.uniform(kb, (H,), minval=-bound, maxval=bound, dtype=jnp.float32)
    diag = jnp.full((H,), 1.0 / math.sqrt(H), dtype=jnp.float32)  # do_similarity=True init
    params = {'w': w, 'b': b, 'diag': diag}

    # func 4 uses a (D, D) bias-free linear on x2 only.
    w4 = jax.random.uniform(kw4, (D, D), minval=-bound, maxval=bound, dtype=jnp.float32)
    params4 = {'w': w4}

    for cf, p in ((1, params), (2, params), (3, params), (4, params4), (5, params)):
        out = jax.block_until_ready(attention_score(x1, x2, p, correlation_func=cf))
        ref = _reference(x1, x2, p, correlation_func=cf)
        np.testing.assert_allclose(np.asarray(out), np.asarray(ref),
                                   rtol=2e-2, atol=2e-2)

    print("KERNEL_OK")
</pallas_src>

<mosaic_0001>
module attributes {stable_mosaic.version = 11 : i64} {
  func.func @_scores_kernel(%arg0: i32, %arg1: i32, %arg2: i32, %arg3: i32, %arg4: memref<1x8x128xbf16, #tpu.memory_space<vmem>>, %arg5: memref<1x128x128xbf16, #tpu.memory_space<vmem>>, %arg6: memref<1x8x128xf32, #tpu.memory_space<vmem>>, %arg7: memref<1x8x128xf32, #tpu.memory_space<vmem>>) attributes {dimension_semantics = [#tpu.dimension_semantics<parallel>, #tpu.dimension_semantics<parallel>, #tpu.dimension_semantics<parallel>, #tpu.dimension_semantics<arbitrary>], iteration_bounds = array<i64: 2, 1, 1, 1>, scalar_prefetch = 0 : i64, scratch_operands = 1 : i64, tpu.core_type = #tpu.core_type<tc>, window_params = [{transform_indices = @transform_0, window_bounds = array<i64: 1, 8, 128>}, {transform_indices = @transform_1, window_bounds = array<i64: 1, 128, 128>}, {transform_indices = @transform_2, window_bounds = array<i64: 1, 8, 128>}]} {
    %c0_i32 = arith.constant 0 : i32
    %0 = arith.cmpi eq, %arg3, %c0_i32 : i32
    %1 = arith.extui %0 : i1 to i32
    %c0_i32_0 = arith.constant 0 : i32
    %2 = arith.cmpi ne, %1, %c0_i32_0 : i32
    scf.if %2 {
      %cst_14 = arith.constant 0.000000e+00 : f32
      %12 = vector.broadcast %cst_14 : f32 to vector<1x8x128xf32>
      %c0_15 = arith.constant 0 : index
      %c0_16 = arith.constant 0 : index
      %c0_17 = arith.constant 0 : index
      %13 = vector.load %arg7[%c0_15, %c0_16, %c0_17] : memref<1x8x128xf32, #tpu.memory_space<vmem>>, vector<1x8x128xf32>
      tpu.vector_store %arg7[%c0_15, %c0_16, %c0_17], %12 {strides = array<i32>} : memref<1x8x128xf32, #tpu.memory_space<vmem>>, vector<1x8x128xf32>,
    } else {
    }
    %c0 = arith.constant 0 : index
    %c0_1 = arith.constant 0 : index
    %c0_2 = arith.constant 0 : index
    %3 = vector.load %arg7[%c0, %c0_1, %c0_2] : memref<1x8x128xf32, #tpu.memory_space<vmem>>, vector<1x8x128xf32>
    %c0_3 = arith.constant 0 : index
    %c0_4 = arith.constant 0 : index
    %c0_5 = arith.constant 0 : index
    %4 = vector.load %arg4[%c0_3, %c0_4, %c0_5] : memref<1x8x128xbf16, #tpu.memory_space<vmem>>, vector<1x8x128xbf16>
    %c0_6 = arith.constant 0 : index
    %c0_7 = arith.constant 0 : index
    %c0_8 = arith.constant 0 : index
    %5 = vector.load %arg5[%c0_6, %c0_7, %c0_8] : memref<1x128x128xbf16, #tpu.memory_space<vmem>>, vector<1x128x128xbf16>
    %cst = arith.constant dense<0.000000e+00> : vector<1x8x128xf32>
    %6 = tpu.matmul %4, %5, %cst {dimension_numbers = #tpu.dot_dimension_numbers<[2], [2], [1], [1], [0, 0, 0, 1, 1, 1], [0], [0]>} : vector<1x8x128xbf16>, vector<1x128x128xbf16>, vector<1x8x128xf32> -> vector<1x8x128xf32>
    %7 = arith.addf %3, %6 : vector<1x8x128xf32>
    %c0_9 = arith.constant 0 : index
    %c0_10 = arith.constant 0 : index
    %c0_11 = arith.constant 0 : index
    %8 = vector.load %arg7[%c0_9, %c0_10, %c0_11] : memref<1x8x128xf32, #tpu.memory_space<vmem>>, vector<1x8x128xf32>
    tpu.vector_store %arg7[%c0_9, %c0_10, %c0_11], %7 {strides = array<i32>} : memref<1x8x128xf32, #tpu.memory_space<vmem>>, vector<1x8x128xf32>,
    %c0_i32_12 = arith.constant 0 : i32
    %9 = arith.cmpi eq, %arg3, %c0_i32_12 : i32
    %10 = arith.extui %9 : i1 to i32
    %c0_i32_13 = arith.constant 0 : i32
    %11 = arith.cmpi ne, %10, %c0_i32_13 : i32
    scf.if %11 {
      %c0_14 = arith.constant 0 : index
      %c0_15 = arith.constant 0 : index
      %c0_16 = arith.constant 0 : index
      %12 = vector.load %arg7[%c0_14, %c0_15, %c0_16] : memref<1x8x128xf32, #tpu.memory_space<vmem>>, vector<1x8x128xf32>
      %c0_17 = arith.constant 0 : index
      %c0_18 = arith.constant 0 : index
      %c0_19 = arith.constant 0 : index
      %13 = vector.load %arg6[%c0_17, %c0_18, %c0_19] : memref<1x8x128xf32, #tpu.memory_space<vmem>>, vector<1x8x128xf32>
      tpu.vector_store %arg6[%c0_17, %c0_18, %c0_19], %12 {strides = array<i32>} : memref<1x8x128xf32, #tpu.memory_space<vmem>>, vector<1x8x128xf32>,
    } else {
    }
    return
  }
  func.func @transform_0(%arg0: i32, %arg1: i32, %arg2: i32, %arg3: i32) -> (i32, i32, i32) {
    %c0_i32 = arith.constant 0 : i32
    return %arg0, %arg1, %arg3 : i32, i32, i32
  }
  func.func @transform_1(%arg0: i32, %arg1: i32, %arg2: i32, %arg3: i32) -> (i32, i32, i32) {
    %c0_i32 = arith.constant 0 : i32
    return %arg0, %arg2, %arg3 : i32, i32, i32
  }
  func.func @transform_2(%arg0: i32, %arg1: i32, %arg2: i32, %arg3: i32) -> (i32, i32, i32) {
    %c0_i32 = arith.constant 0 : i32
    return %arg0, %arg1, %arg2 : i32, i32, i32
  }
}

</mosaic_0001>

<bundles_post_ra>
// kernel: tpu_custom_call.1
= control target key start
LH: loop header
LB: loop body
LE: loop exit
PB: predicated region body
PF: predicated region fallthrough
CT: control target
= control target key end

     0   :  { %7 = vsyncpa [#allocation4], 0  ;;  %s1024_s0 = inlined_call_operand.hbm [shape: bf16[2,8,128], index: 0, kind: input, shape index: {}]   ;;  %s1025_s1 = inlined_call_operand.hbm [shape: bf16[2,128,128], index: 1, kind: input, shape index: {}]   ;;  %s1026_s2 = inlined_call_operand.hbm [shape: f32[2,8,128], index: 2, kind: output, shape index: {}]  }
   0x1   :  { %9 = vsyncpa [#allocation4 + $0x1], 0 }
   0x2   :  { %10 = vsyncpa [#allocation7], 0 }
   0x3   :  { %12 = vsyncpa [#allocation7 + $0x1], 0 }
   0x4   :  { %13 = vsyncpa [#allocation5], 0 }
   0x5   :  { %15 = vsyncpa [#allocation5 + $0x1], 0  ;;  %s797_s9 = smov 0   ;;  %s799_s10 = smov 0  }
   0x6   :  { %s801_s11 = smov 0   ;;  %s803_s12 = smov 0  }
   0x7   :  { %s805_s13 = smov 0   ;;  %s807_s14 = smov 0  }
   0x8 LB: > { %s493_s15 = sadd.s32 4294967295, %s773_s14   ;;  %s494_s16 = sadd.s32 4294967294, %s773_s14   ;;  %s773_s14 = sphi %s807_s14, %s21_s14   ;;  %s769_s13 = sphi %s805_s13, %s1045_s13   ;;  %s765_s12 = sphi %s803_s12, %s1044_s12   ;;  %s761_s11 = sphi %s801_s11, %s1043_s11   ;;  %s757_s10 = sphi %s799_s10, %s1042_s10   ;;  %s753_s9 = sphi %s797_s9, %s1041_s9  }
   0x9   : > { %s47_s17 = sadd.s32 1, %s769_s13  ;;  %s58_s18 = sadd.s32 1, %s761_s11 }
   0xa   : > { %p49_p0 = scmp.ge.s32.totalorder %s47_s17, 2  ;;  %p65_p1 = scmp.ne.s32.totalorder %s761_s11, %s757_s10 }
   0xb   : > { %p66_p2 = scmp.eq.s32.totalorder %s773_s14, 0  ;;  %p71_p3 = scmp.ne.s32.totalorder %s757_s10, %s753_s9 }
   0xc   : > { %s1047_s17 = smov (%p49_p0, %s47_s17), 0  ;;  %p72_p5 = scmp.eq.s32.totalorder %s493_s15, 0 }
   0xd   : > { %p838_p4 = por %p66_p2, %p65_p1  ;;  %s51_s20 = ssub.s32 %s769_s13, %s1047_s17 }
   0xe   : > { %p129_p6 = scmp.eq.s32.totalorder %s493_s15, 1  ;;  %p56_p7 = scmp.eq.s32.totalorder %s51_s20, 0 }
   0xf   : > { %p844_p8 = por %p72_p5, %p71_p3  ;;  %p135_p10 = scmp.eq.s32.totalorder %s494_s16, 1 }
  0x10   : > { %p848_p9 = por %p129_p6, %p65_p1  ;;  %p565_p13 = scmp.lt.s32.totalorder %s773_s14, 2 }
  0x11   : > { %s1030_s21 = scalar_select %p844_p8, 1, 0 }
  0x12   : > { %s1031_s22 = scalar_select %p848_p9, 1, 0 }
  0x13   : > { %s853_s23 = scalar_select %p56_p7, %s761_s11, %s58_s18  }
  0x14   : > { %p855_p11 = por %p135_p10, %p71_p3  ;;  %s862_s25 = sand.u32 1, %s761_s11  }
  0x15   : > { %s497_s26 = sshll.u32 %s862_s25, 2  ;;  %s498_s27 = sshll.u32 %s769_s13, 6 }
  0x16   : > { %s1032_s24 = scalar_select %p855_p11, 1, 0 }
  0x17   : > { %s869_s30 = scalar_lea.hbm %s1024_s0, %s498_s27  ;;  %s159_s3 = scalar_lea.vmem [#allocation3], %s497_s26 }
  0x18   : > { %s168_s4 = sshll.u32 %s159_s3, 4  ;;  %p875_p0 = pnand %p565_p13, %p838_p4  ;;  %s871_s4 = int_to_ptr.vmem [resolvable:$true] %s168_s4 }
  0x19   : > { %s156_s6 = scalar_lea.sflag [#allocation4], %s862_s25  ;;  %s627_s7 = scalar_lea.hbm %s869_s30, 64 }
  0x1a   : > { %p628_p3 = scmp.ne.s32.totalorder %s869_s30, %s627_s7  ;;  %p629_p5 = pneg %p875_p0 }
  0x1b   : > { %s632_s16 = scalar_lea.hbm %s1024_s0, 128  ;;  %p633_p4 = scmp.lt.u32.totalorder %s869_s30, %s1024_s0 }
  0x1c   : > { %p630_p6 = pnand %p629_p5, %p628_p3  ;;  %p634_p10 = scmp.lt.u32.totalorder %s632_s16, %s627_s7 }
  0x1d   : > { %p636_p12 = scmp.lt.u32.totalorder %s627_s7, %s869_s30 }
  0x1e   : > { %p631_p7 = pneg %p630_p6  ;;  %p635_p13 = por %p634_p10, %p633_p4 }
  0x20   : > { %p637_p1 = por %p636_p12, %p635_p13 }
  0x22   : > { %p638_p2 = pnand %p637_p1, %p631_p7 }
  0x24   : > { %641 = shalt.err (!%p638_p2)
}
  0x25   : > { %s642_s20 = scalar_lea.vmem %s871_s4, 64  ;;  %s775_s26 = smov [#allocation3]  }
  0x26   : > { %p643_p3 = scmp.ne.s32.totalorder %s871_s4, %s642_s20  ;;  %s647_s27 = sshll.u32 %s775_s26, 4  ;;  %s648_s27 = int_to_ptr.vmem [resolvable:$false] %s647_s27 }
  0x27   : > { %s649_s28 = scalar_lea.vmem %s648_s27, 128  ;;  %p650_p9 = scmp.lt.s32.totalorder %s871_s4, %s648_s27 }
  0x28   : > { %p645_p6 = pnand %p643_p3, %p629_p5  ;;  %p651_p4 = scmp.lt.s32.totalorder %s649_s28, %s642_s20 }
  0x2a   : > { %p646_p11 = pneg %p645_p6  ;;  %p652_p10 = por %p651_p4, %p650_p9 }
  0x2c   : > { %p653_p12 = pnand %p652_p10, %p646_p11 }
  0x2e   : > { %656 = shalt.err (!%p653_p12)
}
  0x2f   : > { %557 = dma.hbm_to_vmem [thread:$0]  (!%p875_p0), %s869_s30, 64, %s871_s4, %s156_s6  }
  0x30   : > { %p1034_p1 = scmp.lt.s32.totalorder %s773_s14, 3  ;;  %p1035_p2 = scmp.ge.s32.totalorder %s773_s14, 1 }
  0x31   : > { %s499_s3 = sshll.u32 %s862_s25, 6  ;;  %s518_s7 = sshll.u32 %s769_s13, 10 }
  0x32   : > { %p911_p7 = pnand %p1035_p2, %p1034_p1  ;;  %s920_s16 = scalar_lea.hbm %s1025_s1, %s518_s7 }
  0x33   : > { %s179_s18 = scalar_lea.vmem [#allocation6], %s499_s3  ;;  %s176_s30 = scalar_lea.sflag [#allocation7], %s862_s25 }
  0x34   : > { %s189_s19 = sshll.u32 %s179_s18, 4  ;;  %s657_s4 = scalar_lea.hbm %s920_s16, 1024  ;;  %s922_s19 = int_to_ptr.vmem [resolvable:$true] %s189_s19 }
  0x35   : > { %p658_p9 = scmp.ne.s32.totalorder %s920_s16, %s657_s4  ;;  %s662_s26 = scalar_lea.hbm %s1025_s1, 2048 }
  0x36   : > { %p663_p3 = scmp.lt.u32.totalorder %s920_s16, %s1025_s1  ;;  %p664_p6 = scmp.lt.u32.totalorder %s662_s26, %s657_s4 }
  0x37   : > { %p660_p11 = pnand %p658_p9, %p629_p5  ;;  %p666_p10 = scmp.lt.u32.totalorder %s657_s4, %s920_s16 }
  0x38   : > { %p665_p4 = por %p664_p6, %p663_p3 }
  0x39   : > { %p661_p13 = pneg %p660_p11 }
  0x3a   : > { %p667_p12 = por %p666_p10, %p665_p4 }
  0x3c   : > { %p668_p1 = pnand %p667_p12, %p661_p13 }
  0x3e   : > { %671 = shalt.err (!%p668_p1)
}
  0x3f   : > { %s672_s3 = scalar_lea.vmem %s922_s19, 1024  ;;  %s776_s7 = smov [#allocation6]  }
  0x40   : > { %p673_p2 = scmp.ne.s32.totalorder %s922_s19, %s672_s3  ;;  %s677_s8 = sshll.u32 %s776_s7, 4  ;;  %s678_s8 = int_to_ptr.vmem [resolvable:$false] %s677_s8 }
  0x41   : > { %s679_s15 = scalar_lea.vmem %s678_s8, 2048  ;;  %p680_p8 = scmp.lt.s32.totalorder %s922_s19, %s678_s8 }
  0x42   : > { %p675_p9 = pnand %p673_p2, %p629_p5  ;;  %p681_p3 = scmp.lt.s32.totalorder %s679_s15, %s672_s3 }
  0x44   : > { %p676_p11 = pneg %p675_p9  ;;  %p682_p6 = por %p681_p3, %p680_p8 }
  0x46   : > { %p683_p4 = pnand %p682_p6, %p676_p11 }
  0x48   : > { %686 = shalt.err (!%p683_p4)
}
  0x49   : > { %s777_s18 = smov 64   ;;  %s778_s4 = smov 4  }
  0x4a   : > { %560 = dma.hbm_to_vmem [thread:$0]  (!%p875_p0), %s920_s16, 1024, %s922_s19, %s176_s30, %s777_s18, %s777_s18, %s778_s4  }
  0x4b   : > { %201 = sbr.rel (%p911_p7) target bundleno = 378 (0x17a), region = 28  ;;  %s953_s6 = sand.u32 (!%p911_p7), 1, %s757_s10  }
  0x4c   : > { %s503_s20 = sshll.u32 (!%p911_p7), %s953_s6, 2  ;;  %s204_s26 = scalar_lea.sflag (!%p911_p7), [#allocation4], %s953_s6 }
  0x4d   : > { %s957_s27 = scalar_lea.vmem (!%p911_p7), [#allocation3], %s503_s20  ;;  %p1037_p8 = scmp.ne.s32.totalorder (!%p911_p7), %s1030_s21, 0 }
  0x52   : > { %740 = dma.done.wait (%p1037_p8), %s204_s26, 64  }
  0x53   : > { %742 = vsyncadd (%p1037_p8), %s204_s26, 4294967232  ;;  %s504_s25 = sshll.u32 %s953_s6, 6  ;;  %s213_s5 = scalar_lea.sflag [#allocation7], %s953_s6 }
  0x54   : > { %s216_s29 = scalar_lea.vmem [#allocation6], %s504_s25 }
  0x55   : > { %744 = dma.done.wait (%p1037_p8), %s213_s5, 1024  }
  0x56   : > { %746 = vsyncadd (%p1037_p8), %s213_s5, 4294966272  ;;  %v779_v0 = vmov 0.0   ;;  %vm780_vm0 = vmmov 0   ;;  %v619_v1 = vld [vmem:[%s216_s29] sm:$0xff]   ;;  %v620_v2 = vld [vmem:[%s216_s29 + $0x8] sm:$0xff]   ;;  %s505_s21 = sshll.u32 %s953_s6, 3 }
  0x57   : > { %528 = vmatprep.subr.bf16.mxu0 %v779_v0  ;;  %544 = vmatprep.mubr.msk.bf16.mxu0 %vm780_vm0, %v779_v0  ;;  %v621_v3 = vld [vmem:[%s216_s29 + $0x10] sm:$0xff]   ;;  %v622_v4 = vld [vmem:[%s216_s29 + $0x18] sm:$0xff]   ;;  %v623_v5 = vld [vmem:[%s216_s29 + $0x20] sm:$0xff]   ;;  %s241_s16 = scalar_lea.vmem [#allocation8], %s505_s21  ;;  %s515_s30 = sshll.u32 %s765_s12, 7 }
  0x58   : > { %529 = vmatpush3.bf16.xpose.msra.mxu0 %v619_v1  ;;  %v624_v6 = vld [vmem:[%s216_s29 + $0x28] sm:$0xff]   ;;  %v625_v7 = vld [vmem:[%s216_s29 + $0x30] sm:$0xff]   ;;  %v626_v8 = vld [vmem:[%s216_s29 + $0x38] sm:$0xff]   ;;  %s378_s19 = sshll.u32 %s241_s16, 4  ;;  %s977_s7 = scalar_lea.hbm %s1026_s2, %s515_s30  ;;  %s972_s19 = int_to_ptr.vmem [resolvable:$true] %s378_s19 }
  0x59   : > { %530 = vmatprep.subr.bf16.mxu0 %v779_v0  ;;  %v250_v9 = vld [vmem:[%s957_s27] sm:$0xf]  ;;  %s363_s8 = scalar_lea.sflag [#allocation5], %s953_s6  ;;  %s687_s15 = scalar_lea.vmem %s972_s19, 128 }
  0x5a   : > { %p688_p0 = scmp.ne.s32.totalorder %s972_s19, %s687_s15  ;;  %p1038_p5 = scmp.ne.s32.totalorder %s1031_s22, 0 }
  0x5b   : > { %s781_s12 = smov [#allocation8]  }
  0x5c   : > { %p689_p7 = pnand %p688_p0, %p1038_p5  ;;  %s691_s18 = sshll.u32 %s781_s12, 4  ;;  %s692_s18 = int_to_ptr.vmem [resolvable:$false] %s691_s18 }
  0x5d   : > { %s693_s4 = scalar_lea.vmem %s692_s18, 256  ;;  %p694_p10 = scmp.lt.s32.totalorder %s972_s19, %s692_s18 }
  0x5e   : > { %p690_p13 = pneg %p689_p7  ;;  %p695_p12 = scmp.lt.s32.totalorder %s693_s4, %s687_s15 }
  0x60   : > { %531 = vmatpush3.bf16.xpose.msra.mxu0 %v620_v2  ;;  %p696_p1 = por %p695_p12, %p694_p10 }
  0x61   : > { %532 = vmatprep.subr.bf16.mxu0 %v779_v0 }
  0x62   : > { %p697_p2 = pnand %p696_p1, %p690_p13 }
  0x68   : > { %533 = vmatpush3.bf16.xpose.msra.mxu0 %v621_v3 }
  0x69   : > { %534 = vmatprep.subr.bf16.mxu0 %v779_v0 }
  0x70   : > { %535 = vmatpush3.bf16.xpose.msra.mxu0 %v622_v4 }
  0x71   : > { %536 = vmatprep.subr.bf16.mxu0 %v779_v0 }
  0x78   : > { %537 = vmatpush3.bf16.xpose.msra.mxu0 %v623_v5 }
  0x79   : > { %538 = vmatprep.subr.bf16.mxu0 %v779_v0 }
  0x80   : > { %539 = vmatpush3.bf16.xpose.msra.mxu0 %v624_v6 }
  0x81   : > { %540 = vmatprep.subr.bf16.mxu0 %v779_v0 }
  0x88   : > { %541 = vmatpush3.bf16.xpose.msra.mxu0 %v625_v7 }
  0x89   : > { %542 = vmatprep.subr.bf16.mxu0 %v779_v0 }
  0x90   : > { %543 = vmatpush3.bf16.xpose.msra.mxu0 %v626_v8 }
  0x97   : > { %545 = vmatmul.mubr.bf16.vlgmr.msra.gmra.mrb[0].mxu0 %v250_v9 }
 0x16a   : > { %v349_v10 = vpop.f32.mrb[0].mxu0 }
 0x16b   : > { %361 = vst [vmem:[%s241_s16] sm:$0xff] %v349_v10  ;;  %v546_v11 = vpop.f32.mrb[1].mxu0 }
 0x16c   : > { %v352_v12 = vpop.f32.mrb[2].mxu0 }
 0x16d   : > { %700 = shalt.err (!%p697_p2)
}
 0x16e   : > { %s701_s6 = scalar_lea.hbm %s977_s7, 128  ;;  %s705_s27 = scalar_lea.hbm %s1026_s2, 256 }
 0x16f   : > { %p702_p9 = scmp.ne.s32.totalorder %s977_s7, %s701_s6  ;;  %p706_p6 = scmp.lt.u32.totalorder %s977_s7, %s1026_s2 }
 0x170   : > { %p707_p4 = scmp.lt.u32.totalorder %s705_s27, %s701_s6  ;;  %p709_p0 = scmp.lt.u32.totalorder %s701_s6, %s977_s7 }
 0x171   : > { %p703_p11 = pnand %p702_p9, %p1038_p5 }
 0x172   : > { %p708_p8 = por %p707_p4, %p706_p6 }
 0x173   : > { %p704_p3 = pneg %p703_p11 }
 0x174   : > { %p710_p7 = por %p709_p0, %p708_p8 }
 0x176   : > { %p711_p13 = pnand %p710_p7, %p704_p3 }
 0x178   : > { %714 = shalt.err (!%p711_p13)
}
 0x179   : > { %552 = dma.vmem_to_hbm [thread:$0]  (%p1038_p5), %s972_s19, 128, %s977_s7, %s363_s8   ;;  %v547_v13 = vpop.f32.mrb[3].mxu0 }
 0x17a PF: > { %s390_s29 = sand.u32 1, %s753_s9   ;;  %p1039_p10 = scmp.ne.s32.totalorder %s1032_s24, 0 }
 0x17b   : > { %p1040_p12 = scmp.ge.s32.totalorder %s773_s14, 2  ;;  %s391_s21 = scalar_lea.sflag [#allocation5], %s390_s29 }
 0x17d   : > { %p562_p1 = pnand %p1040_p12, %p1039_p10 }
 0x17f   : > { %748 = dma.done.wait (!%p562_p1), %s391_s21, 128  }
 0x180   : > { %750 = vsyncadd (!%p562_p1), %s391_s21, 4294967168  ;;  %s21_s14 = sadd.s32 1, %s773_s14   ;;  %s1041_s9 = smov %s757_s10 }
 0x181   : > { %p18_p2 = scmp.ge.s32.totalorder %s21_s14, 4   ;;  %s1042_s10 = smov %s761_s11 }
 0x182   : > { %s1043_s11 = smov %s853_s23  ;;  %s1044_s12 = smov %s769_s13 }
 0x183   : > { %s1045_s13 = smov %s1047_s17  ;;  %20 = sbr.rel (!%p18_p2) target bundleno = 8 (0x8), region = 94 }
 0x18a   :  { %396 = vsyncpa [#allocation4], 1 }
 0x18b   :  { %398 = vsyncpa [#allocation4 + $0x1], 1 }
 0x18c   :  { %399 = vsyncpa [#allocation7], 1 }
 0x18d   :  { %401 = vsyncpa [#allocation7 + $0x1], 1 }
 0x18e   :  { %402 = vsyncpa [#allocation5], 1 }
 0x18f   :  { %404 = vsyncpa [#allocation5 + $0x1], 1 }

</bundles_post_ra>
